<compile_context>
chip_gen: v7x
topology: tpu7x:2x2x1
jax: 0.10.0
libtpu: 0.0.40
codegen_flags: <defaults>
</compile_context>

<pallas_src>
import jax
import jax.numpy as jnp
from jax.experimental import pallas as pl
from jax.experimental.pallas import tpu as pltpu


def lr_kernel(b_ref, x_ref, w_ref, o_ref):
    # b_ref: (1,)            f32 SMEM  bias scalar
    # x_ref: (F_in, TILE_B)  f32 VMEM  batch tile, batch on lanes
    # w_ref: (F_in, 1)       f32 VMEM  weight column, resident across grid steps
    # o_ref: (1, TILE_B)     f32 VMEM  lane-dense output slab
    prod = x_ref[...] * w_ref[...]                  # VPU mul, w lane-broadcast over batch
    logits = jnp.sum(prod, axis=0, keepdims=True)   # XLU sublane reduce -> (1, TILE_B)
    o_ref[...] = jax.nn.sigmoid(logits + b_ref[0])  # EUP exp; scalar bias from SMEM


def _round_up(x, m):
    return ((x + m - 1) // m) * m


def _pick_tile(B, tile_b):
    """Lane-tile choice: big tiles to amortize per-step overhead, >=2 balanced
    tiles for mid-size B so v7x's two TensorCores both get work."""
    if B > tile_b:
        return tile_b                                      # multiple of 512
    if B >= 1024:
        return min(_round_up(pl.cdiv(B, 2), 512), tile_b)  # nb >= 2, 512-aligned
    return B                                               # tiny batch: one tile


def lr_forward_lanes(x_t, w, b, *, tile_b=65536):
    """Optimized entry point.

    x_t: (F_in, B) f32 (batch on lanes, no transpose inside),
    w:   (F_in, 1) f32, b: (1,) f32  ->  (1, B) f32 lane-dense output.
    """
    f_in, B = x_t.shape
    f_out = w.shape[1]
    assert f_out == 1 and w.shape[0] == f_in

    b1 = b.reshape(1).astype(jnp.float32)

    tb = _pick_tile(B, tile_b)
    nb = pl.cdiv(B, tb)

    # ~21 flops, 1 exp, ~44 bytes of HBM traffic per batch element.
    cost = pl.CostEstimate(
        flops=21 * B,
        transcendentals=B,
        bytes_accessed=44 * B + 4 * (f_in + 1),
    )

    return pl.pallas_call(
        lr_kernel,
        out_shape=jax.ShapeDtypeStruct((1, B), jnp.float32),
        grid=(nb,),
        in_specs=[
            pl.BlockSpec(memory_space=pltpu.MemorySpace.SMEM),   # bias scalar
            pl.BlockSpec((f_in, tb), lambda i: (0, i)),          # x^T batch tile
            pl.BlockSpec((f_in, 1), lambda i: (0, 0)),           # weights, DMA'd once
        ],
        out_specs=pl.BlockSpec((1, tb), lambda i: (0, i)),
        compiler_params=pltpu.CompilerParams(
            dimension_semantics=("parallel",),                   # megacore sharding on v7x
        ),
        cost_estimate=cost,
    )(b1, x_t, w)


def lr_forward(x, w, b, *, tile_b=65536):
    """nn.Module-compatible entry: x (B, F_in) f32 -> (B, 1) f32.

    The transpose / trailing relayout live here (outside the kernel); prefer
    lr_forward_lanes with producer-side (F_in, B) activations in real pipelines.
    """
    B, _ = x.shape
    out = lr_forward_lanes(x.T, w, b, tile_b=tile_b)
    return out.reshape(B, 1)


def reference_forward(x, w, b):
    return jax.nn.sigmoid(x @ w + b.reshape(1, -1))


if __name__ == "__main__":
    key = jax.random.PRNGKey(0)
    kx, kw, kb, kx2 = jax.random.split(key, 4)

    F_in, F_out = 10, 1
    # Deterministic "nn.Linear(10, 1)"-style init: U(-1/sqrt(10), 1/sqrt(10))
    bound = 1.0 / jnp.sqrt(jnp.array(F_in, jnp.float32))
    w = jax.random.uniform(kw, (F_in, F_out), jnp.float32, -bound, bound)
    b = jax.random.uniform(kb, (F_out,), jnp.float32, -bound, bound)

    # Small-batch check (single tile path), matching the module's natural usage.
    B = 8
    x = jax.random.normal(kx, (B, F_in), dtype=jnp.float32)
    out = lr_forward(x, w, b)
    jax.block_until_ready(out)
    ref = reference_forward(x, w, b)
    assert out.shape == (B, F_out)
    assert jnp.allclose(out, ref, atol=1e-5, rtol=1e-5)

    # Mid-size check: exercises the >=2-tile (megacore) path and a partial last tile.
    B2 = 1280  # -> tb = 1024, grid = (2,), last tile partial (256 lanes)
    x2 = jax.random.normal(kx2, (B2, F_in), dtype=jnp.float32)
    out2 = lr_forward(x2, w, b)
    jax.block_until_ready(out2)
    ref2 = reference_forward(x2, w, b)
    assert out2.shape == (B2, F_out)
    assert jnp.allclose(out2, ref2, atol=1e-5, rtol=1e-5)

    # Optimized lane-dense entry (no transpose / no trailing relayout).
    out3 = lr_forward_lanes(x2.T, w, b)
    jax.block_until_ready(out3)
    assert out3.shape == (1, B2)
    assert jnp.allclose(out3.reshape(B2, 1), ref2, atol=1e-5, rtol=1e-5)

    print("KERNEL_OK")
</pallas_src>

<mosaic_0001>
module attributes {stable_mosaic.version = 11 : i64} {
  func.func @lr_kernel(%arg0: i32, %arg1: memref<1xf32, #tpu.memory_space<smem>>, %arg2: memref<10x8xf32, #tpu.memory_space<vmem>>, %arg3: memref<10x1xf32, #tpu.memory_space<vmem>>, %arg4: memref<1x8xf32, #tpu.memory_space<vmem>>) attributes {dimension_semantics = [#tpu.dimension_semantics<parallel>], iteration_bounds = array<i64: 1>, scalar_prefetch = 0 : i64, scratch_operands = 0 : i64, tpu.core_type = #tpu.core_type<tc>, window_params = [{transform_indices = @transform_0, window_bounds = array<i64: 1>}, {transform_indices = @transform_1, window_bounds = array<i64: 10, 8>}, {pipeline_mode = #tpu.pipeline_mode<synchronous>, transform_indices = @transform_2, window_bounds = array<i64: 10, 1>}, {transform_indices = @transform_3, window_bounds = array<i64: 1, 8>}]} {
    %c0 = arith.constant 0 : index
    %c0_0 = arith.constant 0 : index
    %0 = vector.load %arg2[%c0, %c0_0] : memref<10x8xf32, #tpu.memory_space<vmem>>, vector<10x8xf32>
    %c0_1 = arith.constant 0 : index
    %c0_2 = arith.constant 0 : index
    %1 = vector.load %arg3[%c0_1, %c0_2] : memref<10x1xf32, #tpu.memory_space<vmem>>, vector<10x1xf32>
    %2 = vector.broadcast %1 : vector<10x1xf32> to vector<10x8xf32>
    %3 = arith.mulf %0, %2 : vector<10x8xf32>
    %cst = arith.constant dense<0.000000e+00> : vector<8xf32>
    %4 = vector.multi_reduction <add>, %3, %cst [0] : vector<10x8xf32> to vector<8xf32>
    %5 = vector.shape_cast %4 : vector<8xf32> to vector<1x8xf32>
    %c0_3 = arith.constant 0 : index
    %6 = memref.load %arg1[%c0_3] : memref<1xf32, #tpu.memory_space<smem>>
    %7 = vector.broadcast %6 : f32 to vector<1x8xf32>
    %8 = arith.addf %5, %7 : vector<1x8xf32>
    %9 = arith.negf %8 : vector<1x8xf32>
    %10 = math.exp %9 : vector<1x8xf32>
    %cst_4 = arith.constant 1.000000e+00 : f32
    %11 = vector.broadcast %cst_4 : f32 to vector<1x8xf32>
    %12 = arith.addf %11, %10 : vector<1x8xf32>
    %13 = arith.divf %11, %12 : vector<1x8xf32>
    %c0_5 = arith.constant 0 : index
    %c0_6 = arith.constant 0 : index
    %14 = vector.load %arg4[%c0_5, %c0_6] : memref<1x8xf32, #tpu.memory_space<vmem>>, vector<1x8xf32>
    tpu.vector_store %arg4[%c0_5, %c0_6], %13 {strides = array<i32>} : memref<1x8xf32, #tpu.memory_space<vmem>>, vector<1x8xf32>,
    return
  }
  func.func @transform_0(%arg0: i32) -> i32 {
    %c0_i32 = arith.constant 0 : i32
    %c0_i32_0 = arith.constant 0 : i32
    return %c0_i32 : i32
  }
  func.func @transform_1(%arg0: i32) -> (i32, i32) {
    %c0_i32 = arith.constant 0 : i32
    %c0_i32_0 = arith.constant 0 : i32
    return %c0_i32, %arg0 : i32, i32
  }
  func.func @transform_2(%arg0: i32) -> (i32, i32) {
    %c0_i32 = arith.constant 0 : i32
    %c0_i32_0 = arith.constant 0 : i32
    %c0_i32_1 = arith.constant 0 : i32
    return %c0_i32, %c0_i32_0 : i32, i32
  }
  func.func @transform_3(%arg0: i32) -> (i32, i32) {
    %c0_i32 = arith.constant 0 : i32
    %c0_i32_0 = arith.constant 0 : i32
    return %c0_i32, %arg0 : i32, i32
  }
}

</mosaic_0001>

<bundles_post_ra>
// kernel: tpu_custom_call.1
= control target key start
LH: loop header
LB: loop body
LE: loop exit
PB: predicated region body
PF: predicated region fallthrough
CT: control target
= control target key end

     0   :  { %v100_v1 = vmov 0   ;;  %s149_s0 = inlined_call_operand.<no memory space> [shape: f32[1], index: 0, kind: input, shape index: {}]   ;;  %s150_s1 = inlined_call_operand.vmem [shape: f32[10,8], index: 1, kind: input, shape index: {}]   ;;  %s151_s2 = inlined_call_operand.vmem [shape: f32[10,1], index: 2, kind: input, shape index: {}]   ;;  %s152_s3 = inlined_call_operand.hbm [shape: f32[1,8], index: 3, kind: output, shape index: {}]  }
   0x1   :  { %v18_v0 = vld [vmem:[%s151_s2] sm:$0xff]  ;;  %71 = vset.pattern.permute.xlu0 %v100_v1 }
   0x2   :  { %9 = vsyncpa [#allocation4], 0  ;;  %22 = vperm.xlu0 %71, %v18_v0   ;;  %v19_v2 = vld [vmem:[%s151_s2 + $0x8] sm:$0x3]  ;;  %v16_v4 = vld [vmem:[%s150_s1] sm:$0xff]  ;;  %vm32_vm0 = vcmask 64512   ;;  %v44_v17 = vstv %s149_s0 }
   0x3   :  { %v17_v5 = vld [vmem:[%s150_s1 + $0x8] sm:$0x3]  ;;  %vm34_vm1 = vcmask 58368   ;;  %s101_s1 = smov [#allocation3]   ;;  %vm52_vm2 = vcmask 57344  }
   0x4   :  { %s60_s21 = sshll.u32 %s101_s1, 4  ;;  %s61_s21 = int_to_ptr.vmem [resolvable:$true] %s60_s21 }
   0x5   :  { %s76_s22 = scalar_lea.vmem %s61_s21, 16  ;;  %s80_s23 = scalar_lea.vmem %s61_s21, 32 }
   0x6   :  { %27 = vperm.xlu0 %71, %v19_v2   ;;  %p77_p0 = scmp.ne.s32.totalorder %s61_s21, %s76_s22  ;;  %p81_p1 = scmp.lt.s32.totalorder %s61_s21, %s61_s21 }
   0x7   :  { %p82_p2 = scmp.lt.s32.totalorder %s80_s23, %s76_s22 }
   0x9   :  { %p83_p3 = por %p82_p2, %p81_p1 }
   0xb   :  { %p84_p4 = pnand %p83_p3, %p77_p0 }
  0x81   :  { %v23_v3 = vpop.permute.xlu0 %22 }
  0x82   :  { %v30_v6 = vmul.f32 %v23_v3, %v16_v4 }
  0x84   :  { %v33_v9 = vsel %vm32_vm0, %v30_v6, 0.0 }
  0x85   :  { %v28_v7 = vpop.permute.xlu0 %27 }
  0x86   :  { %v31_v8 = vmul.f32 %v28_v7, %v17_v5 }
  0x88   :  { %v35_v10 = vsel %vm34_vm1, %v31_v8, 0.0 }
  0x89   :  { %v36_v11 = vadd.f32 %v35_v10, %v33_v9 }
  0x8b   :  { %v37_v12 = vrot.slane %v36_v11, 4 }
  0x8d   :  { %v38_v13 = vadd.f32 %v37_v12, %v36_v11 }
  0x8f   :  { %v39_v14 = vrot.slane %v38_v13, 2 }
  0x91   :  { %v40_v15 = vadd.f32 %v39_v14, %v38_v13 }
  0x93   :  { %v41_v16 = vrot.slane %v40_v15, 1 }
  0x95   :  { %v42_v18 = vadd.f32 %v41_v16, %v40_v15 }
  0x97   :  { %v45_v19 = vadd.f32 %v44_v17, %v42_v18 }
  0x99   :  { %v68_v20 = vmul.f32 -1.442695, %v45_v19 }
  0x9b   :  { %72 = vpow2.f32 %v68_v20 }
  0xa5   :  { %v73_v21 = vpop.eup %72 }
  0xa6   :  { %v49_v22 = vadd.f32 1.0, %v73_v21 }
  0xa8   :  { %74 = vrcp.f32 %v49_v22 }
  0xb2   :  { %v75_v23 = vpop.eup %74 }
  0xb3   :  { %53 = vst.msk [vmem:[#allocation3] sm:$0x1] %vm52_vm2, %v75_v23 }
  0xb4   :  { %87 = shalt.err (!%p84_p4)
}
  0xb5   :  { %s88_s25 = scalar_lea.hbm %s152_s3, 16 }
  0xb6   :  { %p89_p5 = scmp.ne.s32.totalorder %s152_s3, %s88_s25  ;;  %p92_p6 = scmp.lt.u32.totalorder %s88_s25, %s152_s3 }
  0xb8   :  { %p94_p7 = pnand %p92_p6, %p89_p5 }
  0xba   :  { %97 = shalt.err (!%p94_p7)
}
  0xbb   :  { %63 = dma.vmem_to_hbm [thread:$0]  %s61_s21, 16, %s152_s3, [#allocation4]  }
  0xbc   :  { %98 = dma.done.wait [#allocation4], 16  }
  0xbd   :  { %99 = vsyncadd [#allocation4], 4294967280 }
  0xbe   :  { %67 = vsyncpa [#allocation4], 1 }

</bundles_post_ra>
